<compile_context>
chip_gen: v7x
topology: tpu7x:2x2x1
jax: 0.10.0
libtpu: 0.0.40
codegen_flags: <defaults>
</compile_context>

<pallas_src>
import jax
import jax.numpy as jnp
import numpy as np
from jax.experimental import pallas as pl
from jax.experimental.pallas import tpu as pltpu


# ----------------------------------------------------------------------------
# Kernel: one batch tile, n_layers cross layers, params packed in one VMEM ref.
# ----------------------------------------------------------------------------
def make_cross_kernel(n_layers: int):
    def kernel(x_ref, x0_ref, params_ref, out_ref):
        x0 = x0_ref[...].astype(jnp.float32)               # [TB, D]
        x = x_ref[...].astype(jnp.float32)                 # [TB, D]
        for l in range(n_layers):                          # unrolled Python loop
            base = 4 * l
            a = params_ref[base + 0:base + 1, :]           # (1, D) folded BN scale
            c = params_ref[base + 1:base + 2, :]           # (1, D) folded BN shift
            w = params_ref[base + 2:base + 3, :]           # (1, D) cross weight^T
            b = params_ref[base + 3:base + 4, :]           # (1, D) cross bias^T
            xb = x * a + c                                 # BatchNorm1d (eval, folded)
            # bmm(x0[:,:,None], xb[:,None,:]) @ w  ==  x0 * (xb . w)
            s = jnp.sum(xb * w, axis=-1, keepdims=True)    # (TB, 1)  VPU mul + XLU sum
            x = x0 * s + b + xb                            # cross update
        out_ref[...] = x.astype(out_ref.dtype)
    return kernel


# ----------------------------------------------------------------------------
# Host-side parameter folding / packing.
# ----------------------------------------------------------------------------
def pack_cross_params(layer_params, bn_eps=1e-8):
    """layer_params: list of (gamma, beta, mean, var, weight[D,1], bias[D,1]).
    Folds eval-mode BN into an affine and packs everything into one (4*L, D) array."""
    rows = []
    for (gamma, beta, mean, var, weight, bias) in layer_params:
        a = gamma * jax.lax.rsqrt(var + bn_eps)
        c = beta - mean * a
        rows += [a, c, weight[:, 0], bias[:, 0]]
    return jnp.stack(rows, axis=0).astype(jnp.float32)      # (4L, D)


def cross_network_pallas(x, x0, packed_params, *, block_b=128):
    B, D = x.shape
    n_layers = packed_params.shape[0] // 4
    assert B % block_b == 0, "demo keeps B a multiple of the batch tile"
    grid = (B // block_b,)
    return pl.pallas_call(
        make_cross_kernel(n_layers),
        out_shape=jax.ShapeDtypeStruct((B, D), jnp.float32),
        grid=grid,
        in_specs=[
            pl.BlockSpec((block_b, D), lambda i: (i, 0)),            # x
            pl.BlockSpec((block_b, D), lambda i: (i, 0)),            # x0
            pl.BlockSpec((4 * n_layers, D), lambda i: (0, 0)),       # packed params (resident)
        ],
        out_specs=pl.BlockSpec((block_b, D), lambda i: (i, 0)),
        compiler_params=pltpu.CompilerParams(
            dimension_semantics=("parallel",),   # shard batch tiles across v7x's 2 TCs
        ),
    )(x, x0, packed_params)


# ----------------------------------------------------------------------------
# Pure-JAX reference mirroring the exact PyTorch ops (eval-mode BN).
# ----------------------------------------------------------------------------
def cross_layer_ref(x, x0, gamma, beta, mean, var, weight, bias, eps=1e-8):
    xb = (x - mean) / jnp.sqrt(var + eps) * gamma + beta          # self.bn(x), eval
    outer = jnp.einsum("bi,bj->bij", x0, xb)                      # bmm(x0.unsq(2), xb.unsq(2).T)
    out = jnp.einsum("bij,jk->bik", outer, weight)                # matmul(out, weight [D,1])
    out = out + bias                                              # out.add_(bias [D,1])
    out = out[..., 0]                                             # squeeze(dim=2)
    return out + xb                                               # out.add_(x)


if __name__ == "__main__":
    key = jax.random.PRNGKey(0)

    B, D = 256, 128          # layer_size = 128 (lane-dense), batch 256 -> grid of 2 tiles
    n_layers = 3
    bn_eps = 1e-8

    keys = iter(jax.random.split(key, 4 + 6 * n_layers))

    x = jax.random.normal(next(keys), (B, D), dtype=jnp.float32)
    x0 = jax.random.normal(next(keys), (B, D), dtype=jnp.float32)

    layer_params = []
    for _ in range(n_layers):
        gamma = 1.0 + 0.1 * jax.random.normal(next(keys), (D,), dtype=jnp.float32)
        beta = 0.1 * jax.random.normal(next(keys), (D,), dtype=jnp.float32)
        mean = 0.1 * jax.random.normal(next(keys), (D,), dtype=jnp.float32)
        var = jnp.abs(1.0 + 0.1 * jax.random.normal(next(keys), (D,), dtype=jnp.float32))
        weight = 1e-2 * jax.random.normal(next(keys), (D, 1), dtype=jnp.float32)
        bias = 1e-2 * jax.random.normal(next(keys), (D, 1), dtype=jnp.float32)
        layer_params.append((gamma, beta, mean, var, weight, bias))

    # ---- single CrossLayer: exactly the module's forward ----
    out1 = cross_network_pallas(x, x0, pack_cross_params(layer_params[:1], bn_eps))
    out1 = jax.block_until_ready(out1)
    ref1 = cross_layer_ref(x, x0, *layer_params[0], eps=bn_eps)
    assert out1.shape == (B, D)
    np.testing.assert_allclose(np.asarray(out1), np.asarray(ref1), rtol=1e-5, atol=1e-5)

    # ---- stack of 3 cross layers (how CrossLayer is composed in the cross network) ----
    out3 = cross_network_pallas(x, x0, pack_cross_params(layer_params, bn_eps))
    out3 = jax.block_until_ready(out3)
    ref = x
    for lp in layer_params:
        ref = cross_layer_ref(ref, x0, *lp, eps=bn_eps)
    np.testing.assert_allclose(np.asarray(out3), np.asarray(ref), rtol=1e-5, atol=1e-5)

    print("KERNEL_OK")
</pallas_src>

<mosaic_0001>
module attributes {stable_mosaic.version = 11 : i64} {
  func.func @kernel(%arg0: i32, %arg1: memref<128x128xf32, #tpu.memory_space<vmem>>, %arg2: memref<128x128xf32, #tpu.memory_space<vmem>>, %arg3: memref<4x128xf32, #tpu.memory_space<vmem>>, %arg4: memref<128x128xf32, #tpu.memory_space<vmem>>) attributes {dimension_semantics = [#tpu.dimension_semantics<parallel>], iteration_bounds = array<i64: 2>, scalar_prefetch = 0 : i64, scratch_operands = 0 : i64, tpu.core_type = #tpu.core_type<tc>, window_params = [{transform_indices = @transform_0, window_bounds = array<i64: 128, 128>}, {transform_indices = @transform_1, window_bounds = array<i64: 128, 128>}, {pipeline_mode = #tpu.pipeline_mode<synchronous>, transform_indices = @transform_2, window_bounds = array<i64: 4, 128>}, {transform_indices = @transform_3, window_bounds = array<i64: 128, 128>}]} {
    %c0 = arith.constant 0 : index
    %c0_0 = arith.constant 0 : index
    %0 = vector.load %arg2[%c0, %c0_0] : memref<128x128xf32, #tpu.memory_space<vmem>>, vector<128x128xf32>
    %c0_1 = arith.constant 0 : index
    %c0_2 = arith.constant 0 : index
    %1 = vector.load %arg1[%c0_1, %c0_2] : memref<128x128xf32, #tpu.memory_space<vmem>>, vector<128x128xf32>
    %c0_3 = arith.constant 0 : index
    %c0_4 = arith.constant 0 : index
    %2 = vector.load %arg3[%c0_3, %c0_4] : memref<4x128xf32, #tpu.memory_space<vmem>>, vector<1x128xf32>
    %c1 = arith.constant 1 : index
    %c0_5 = arith.constant 0 : index
    %3 = vector.load %arg3[%c1, %c0_5] : memref<4x128xf32, #tpu.memory_space<vmem>>, vector<1x128xf32>
    %c2 = arith.constant 2 : index
    %c0_6 = arith.constant 0 : index
    %4 = vector.load %arg3[%c2, %c0_6] : memref<4x128xf32, #tpu.memory_space<vmem>>, vector<1x128xf32>
    %c3 = arith.constant 3 : index
    %c0_7 = arith.constant 0 : index
    %5 = vector.load %arg3[%c3, %c0_7] : memref<4x128xf32, #tpu.memory_space<vmem>>, vector<1x128xf32>
    %6 = vector.broadcast %2 : vector<1x128xf32> to vector<128x128xf32>
    %7 = arith.mulf %1, %6 : vector<128x128xf32>
    %8 = vector.broadcast %3 : vector<1x128xf32> to vector<128x128xf32>
    %9 = arith.addf %7, %8 : vector<128x128xf32>
    %10 = vector.broadcast %4 : vector<1x128xf32> to vector<128x128xf32>
    %11 = arith.mulf %9, %10 : vector<128x128xf32>
    %cst = arith.constant dense<0.000000e+00> : vector<128xf32>
    %12 = vector.multi_reduction <add>, %11, %cst [1] : vector<128x128xf32> to vector<128xf32>
    %13 = vector.shape_cast %12 : vector<128xf32> to vector<128x1xf32>
    %14 = vector.broadcast %13 : vector<128x1xf32> to vector<128x128xf32>
    %15 = arith.mulf %0, %14 : vector<128x128xf32>
    %16 = vector.broadcast %5 : vector<1x128xf32> to vector<128x128xf32>
    %17 = arith.addf %15, %16 : vector<128x128xf32>
    %18 = arith.addf %17, %9 : vector<128x128xf32>
    %c0_8 = arith.constant 0 : index
    %c0_9 = arith.constant 0 : index
    %19 = vector.load %arg4[%c0_8, %c0_9] : memref<128x128xf32, #tpu.memory_space<vmem>>, vector<128x128xf32>
    tpu.vector_store %arg4[%c0_8, %c0_9], %18 {strides = array<i32>} : memref<128x128xf32, #tpu.memory_space<vmem>>, vector<128x128xf32>,
    return
  }
  func.func @transform_0(%arg0: i32) -> (i32, i32) {
    %c0_i32 = arith.constant 0 : i32
    %c0_i32_0 = arith.constant 0 : i32
    return %arg0, %c0_i32 : i32, i32
  }
  func.func @transform_1(%arg0: i32) -> (i32, i32) {
    %c0_i32 = arith.constant 0 : i32
    %c0_i32_0 = arith.constant 0 : i32
    return %arg0, %c0_i32 : i32, i32
  }
  func.func @transform_2(%arg0: i32) -> (i32, i32) {
    %c0_i32 = arith.constant 0 : i32
    %c0_i32_0 = arith.constant 0 : i32
    %c0_i32_1 = arith.constant 0 : i32
    return %c0_i32, %c0_i32_0 : i32, i32
  }
  func.func @transform_3(%arg0: i32) -> (i32, i32) {
    %c0_i32 = arith.constant 0 : i32
    %c0_i32_0 = arith.constant 0 : i32
    return %arg0, %c0_i32 : i32, i32
  }
}

</mosaic_0001>

<bundles_post_ra>
// kernel: tpu_custom_call.1
= control target key start
LH: loop header
LB: loop body
LE: loop exit
PB: predicated region body
PF: predicated region fallthrough
CT: control target
= control target key end

     0   :  { %8 = vsyncpa [#allocation3], 0  ;;  %s1208_s0 = inlined_call_operand.hbm [shape: f32[256,128], index: 0, kind: input, shape index: {}]   ;;  %s1209_s1 = inlined_call_operand.hbm [shape: f32[256,128], index: 1, kind: input, shape index: {}]   ;;  %s1210_s2 = inlined_call_operand.vmem [shape: f32[4,128], index: 2, kind: input, shape index: {}]   ;;  %s1211_s3 = inlined_call_operand.hbm [shape: f32[256,128], index: 3, kind: output, shape index: {}]  }
   0x1   :  { %10 = vsyncpa [#allocation3 + $0x1], 0 }
   0x2   :  { %11 = vsyncpa [#allocation6], 0 }
   0x3   :  { %13 = vsyncpa [#allocation6 + $0x1], 0 }
   0x4   :  { %14 = vsyncpa [#allocation4], 0 }
   0x5   :  { %16 = vsyncpa [#allocation4 + $0x1], 0  ;;  %s777_s12 = smov 0   ;;  %s779_s13 = smov 0  }
   0x6   :  { %s781_s14 = smov 0   ;;  %s783_s15 = smov 0  }
   0x7 LB: > { %s798_s16 = sadd.s32 4294967295, %s748_s15   ;;  %s538_s17 = sadd.s32 4294967294, %s748_s15   ;;  %s748_s15 = sphi %s783_s15, %s1227_s15   ;;  %s744_s14 = sphi %s781_s14, %s1226_s14   ;;  %s740_s13 = sphi %s779_s13, %s1225_s13   ;;  %s736_s12 = sphi %s777_s12, %s1224_s12  }
   0x8   : > { %s802_s18 = sadd.s32 1, %s748_s15   ;;  %s29_s19 = sadd.s32 1, %s744_s14 }
   0x9   : > { %s26_s20 = ssub.s32 %s748_s15, %s802_s18  ;;  %p36_p0 = scmp.ne.s32.totalorder %s744_s14, %s740_s13 }
   0xa   : > { %p27_p1 = scmp.eq.s32.totalorder %s26_s20, 0  ;;  %p37_p2 = scmp.eq.s32.totalorder %s748_s15, 0 }
   0xb   : > { %p42_p3 = scmp.ne.s32.totalorder %s740_s13, %s736_s12  ;;  %p43_p4 = scmp.eq.s32.totalorder %s798_s16, 0 }
   0xc   : > { %s814_s21 = scalar_select %p27_p1, %s744_s14, %s29_s19  }
   0xd   : > { %p816_p5 = por %p37_p2, %p36_p0  ;;  %p820_p6 = por %p43_p4, %p42_p3 }
   0xe   : > { %p113_p7 = scmp.eq.s32.totalorder %s798_s16, 1  ;;  %p119_p8 = scmp.eq.s32.totalorder %s538_s17, 1 }
   0xf   : > { %s1215_s23 = scalar_select %p820_p6, 1, 0 }
  0x10   : > { %p580_p10 = scmp.lt.s32.totalorder %s748_s15, 2  ;;  %p827_p11 = por %p113_p7, %p36_p0 }
  0x11   : > { %p831_p12 = por %p119_p8, %p42_p3  ;;  %s836_s26 = sand.u32 1, %s744_s14  }
  0x12   : > { %s1216_s24 = scalar_select %p827_p11, 1, 0 }
  0x13   : > { %s1217_s25 = scalar_select %p831_p12, 1, 0 }
  0x14   : > { %s560_s27 = sshll.u32 %s748_s15, 11  ;;  %s541_s28 = sshll.u32 %s836_s26, 7 }
  0x15   : > { %s845_s4 = scalar_lea.hbm %s1208_s0, %s560_s27  ;;  %s146_s5 = scalar_lea.vmem [#allocation2], %s541_s28 }
  0x16   : > { %s153_s6 = sshll.u32 %s146_s5, 4  ;;  %p851_p13 = pnand %p580_p10, %p816_p5  ;;  %s855_s6 = int_to_ptr.vmem [resolvable:$true] %s153_s6 }
  0x17   : > { %s143_s8 = scalar_lea.sflag [#allocation3], %s836_s26  ;;  %s618_s9 = scalar_lea.hbm %s845_s4, 2048 }
  0x18   : > { %p619_p0 = scmp.ne.s32.totalorder %s845_s4, %s618_s9  ;;  %p620_p1 = pneg %p851_p13 }
  0x19   : > { %s623_s17 = scalar_lea.hbm %s1208_s0, 4096  ;;  %p624_p4 = scmp.lt.u32.totalorder %s845_s4, %s1208_s0 }
  0x1a   : > { %p621_p2 = pnand %p620_p1, %p619_p0  ;;  %p625_p5 = scmp.lt.u32.totalorder %s623_s17, %s618_s9 }
  0x1b   : > { %p627_p8 = scmp.lt.u32.totalorder %s618_s9, %s845_s4 }
  0x1c   : > { %p622_p3 = pneg %p621_p2  ;;  %p626_p7 = por %p625_p5, %p624_p4 }
  0x1e   : > { %p628_p10 = por %p627_p8, %p626_p7 }
  0x20   : > { %p629_p9 = pnand %p628_p10, %p622_p3 }
  0x22   : > { %632 = shalt.err (!%p629_p9)
}
  0x23   : > { %s633_s22 = scalar_lea.vmem %s855_s6, 2048  ;;  %s750_s29 = smov [#allocation2]  }
  0x24   : > { %p634_p0 = scmp.ne.s32.totalorder %s855_s6, %s633_s22  ;;  %s638_s30 = sshll.u32 %s750_s29, 4  ;;  %s639_s30 = int_to_ptr.vmem [resolvable:$false] %s638_s30 }
  0x25   : > { %s640_s5 = scalar_lea.vmem %s639_s30, 4096  ;;  %p641_p11 = scmp.lt.s32.totalorder %s855_s6, %s639_s30 }
  0x26   : > { %p636_p2 = pnand %p634_p0, %p620_p1  ;;  %p642_p4 = scmp.lt.s32.totalorder %s640_s5, %s633_s22 }
  0x28   : > { %p637_p12 = pneg %p636_p2  ;;  %p643_p5 = por %p642_p4, %p641_p11 }
  0x2a   : > { %p644_p7 = pnand %p643_p5, %p637_p12 }
  0x2c   : > { %647 = shalt.err (!%p644_p7)
}
  0x2d   : > { %s751_s9 = smov 128   ;;  %s752_s10 = smov 8  }
  0x2e   : > { %572 = dma.hbm_to_vmem [thread:$0]  (!%p851_p13), %s845_s4, 2048, %s855_s6, %s143_s8, %s751_s9, %s751_s9, %s752_s10  }
  0x2f   : > { %p547_p9 = scmp.ge.s32.totalorder %s748_s15, 1  ;;  %p182_p11 = scmp.lt.s32.totalorder %s748_s15, 3 }
  0x30   : > { %s899_s20 = scalar_lea.hbm %s1209_s1, %s560_s27  ;;  %s167_s22 = scalar_lea.vmem [#allocation5], %s541_s28 }
  0x31   : > { %p890_p12 = pnand %p547_p9, %p182_p11  ;;  %s174_s29 = sshll.u32 %s167_s22, 4  ;;  %s903_s29 = int_to_ptr.vmem [resolvable:$true] %s174_s29 }
  0x32   : > { %s164_s4 = scalar_lea.sflag [#allocation6], %s836_s26  ;;  %s648_s6 = scalar_lea.hbm %s899_s20, 2048 }
  0x33   : > { %p649_p3 = scmp.ne.s32.totalorder %s899_s20, %s648_s6  ;;  %s653_s27 = scalar_lea.hbm %s1209_s1, 4096 }
  0x34   : > { %p654_p0 = scmp.lt.u32.totalorder %s899_s20, %s1209_s1  ;;  %p655_p2 = scmp.lt.u32.totalorder %s653_s27, %s648_s6 }
  0x35   : > { %p651_p8 = pnand %p649_p3, %p620_p1  ;;  %p657_p5 = scmp.lt.u32.totalorder %s648_s6, %s899_s20 }
  0x36   : > { %p656_p4 = por %p655_p2, %p654_p0 }
  0x37   : > { %p652_p10 = pneg %p651_p8 }
  0x38   : > { %p658_p7 = por %p657_p5, %p656_p4 }
  0x3a   : > { %p659_p9 = pnand %p658_p7, %p652_p10 }
  0x3c   : > { %662 = shalt.err (!%p659_p9)
}
  0x3d   : > { %s663_s28 = scalar_lea.vmem %s903_s29, 2048  ;;  %s753_s19 = smov [#allocation5]  }
  0x3e   : > { %p664_p11 = scmp.ne.s32.totalorder %s903_s29, %s663_s28  ;;  %s668_s22 = sshll.u32 %s753_s19, 4  ;;  %s669_s22 = int_to_ptr.vmem [resolvable:$false] %s668_s22 }
  0x3f   : > { %s670_s8 = scalar_lea.vmem %s669_s22, 4096  ;;  %p671_p6 = scmp.lt.s32.totalorder %s903_s29, %s669_s22 }
  0x40   : > { %p666_p3 = pnand %p664_p11, %p620_p1  ;;  %p672_p0 = scmp.lt.s32.totalorder %s670_s8, %s663_s28 }
  0x42   : > { %p667_p8 = pneg %p666_p3  ;;  %p673_p2 = por %p672_p0, %p671_p6 }
  0x44   : > { %p674_p4 = pnand %p673_p2, %p667_p8 }
  0x46   : > { %677 = shalt.err (!%p674_p4)
}
  0x47   : > { %575 = dma.hbm_to_vmem [thread:$0]  (!%p851_p13), %s899_s20, 2048, %s903_s29, %s164_s4, %s751_s9, %s751_s9, %s752_s10  }
  0x48   : > { %186 = sbr.rel (%p890_p12) target bundleno = 282 (0x11a), region = 32  ;;  %s937_s6 = sand.u32 (!%p890_p12), 1, %s740_s13  }
  0x49   : > { %s940_s30 = sshll.u32 (!%p890_p12), %s937_s6, 7  ;;  %s189_s7 = scalar_lea.sflag (!%p890_p12), [#allocation3], %s937_s6 }
  0x4a   : > { %s944_s27 = scalar_lea.vmem (!%p890_p12), [#allocation2], %s940_s30  ;;  %p1220_p6 = scmp.ne.s32.totalorder (!%p890_p12), %s1215_s23, 0 }
  0x4f   : > { %723 = dma.done.wait (%p1220_p6), %s189_s7, 2048  }
  0x50   : > { %725 = vsyncadd (%p1220_p6), %s189_s7, 4294965248  ;;  %s198_s26 = scalar_lea.sflag [#allocation6], %s937_s6  ;;  %s952_s9 = scalar_lea.vmem [#allocation5], %s940_s30 }
  0x51   : > { %727 = dma.done.wait (%p1220_p6), %s198_s26, 2048  }
  0x52   : > { %729 = vsyncadd (%p1220_p6), %s198_s26, 4294965248  ;;  %v250_v0 = vld [vmem:[%s944_s27 + $0x10] sm:$0xff]  ;;  %v962_v1 = vld [vmem:[%s1210_s2] ss:$0 sm:$0xff]  ;;  %s1100_s28 = scalar_lea.vmem [#allocation7], %s940_s30  ;;  %s562_s19 = sshll.u32 %s798_s16, 11 }
  0x53   : > { %v967_v2 = vld [vmem:[%s1210_s2 + $0x1] ss:$0 sm:$0xff]  ;;  %v972_v3 = vld [vmem:[%s1210_s2 + $0x2] ss:$0 sm:$0xff]  ;;  %v274_v4 = vmul.f32 %v962_v1, %v250_v0  ;;  %v251_v6 = vld [vmem:[%s944_s27 + $0x18] sm:$0xff]  ;;  %s442_s22 = sshll.u32 %s1100_s28, 4  ;;  %s1159_s7 = scalar_lea.hbm %s1211_s3, %s562_s19  ;;  %s1161_s22 = int_to_ptr.vmem [resolvable:$true] %s442_s22 }
  0x54   : > { %v248_v5 = vld [vmem:[%s944_s27] sm:$0xff]  ;;  %v275_v8 = vmul.f32 %v962_v1, %v251_v6  ;;  %v249_v9 = vld [vmem:[%s944_s27 + $0x8] sm:$0xff]  ;;  %v255_v18 = vld [vmem:[%s944_s27 + $0x38] sm:$0xff]  ;;  %s429_s16 = scalar_lea.sflag [#allocation4], %s937_s6  ;;  %p1221_p1 = scmp.ne.s32.totalorder %s1216_s24, 0 }
  0x55   : > { %v272_v7 = vmul.f32 %v962_v1, %v248_v5  ;;  %v253_v10 = vld [vmem:[%s944_s27 + $0x28] sm:$0xff]  ;;  %v252_v11 = vld [vmem:[%s944_s27 + $0x20] sm:$0xff]  ;;  %v983_v12 = vadd.f32 %v967_v2, %v274_v4  ;;  %v273_v13 = vmul.f32 %v962_v1, %v249_v9  ;;  %v254_v21 = vld [vmem:[%s944_s27 + $0x30] sm:$0xff]  ;;  %v279_v25 = vmul.f32 %v962_v1, %v255_v18  ;;  %s754_s26 = smov [#allocation7]  }
  0x56   : > { %v277_v14 = vmul.f32 %v962_v1, %v253_v10  ;;  %v991_v16 = vadd.f32 %v967_v2, %v275_v8  ;;  %v276_v17 = vmul.f32 %v962_v1, %v252_v11  ;;  %v278_v28 = vmul.f32 %v962_v1, %v254_v21  ;;  %v257_v29 = vld [vmem:[%s944_s27 + $0x48] sm:$0xff]  ;;  %v256_v30 = vld [vmem:[%s944_s27 + $0x40] sm:$0xff]  ;;  %v259_v37 = vld [vmem:[%s944_s27 + $0x58] sm:$0xff] }
  0x57   : > { %v988_v15 = vadd.f32 %v967_v2, %v272_v7  ;;  %v314_v19 = vmul.f32 %v972_v3, %v983_v12  ;;  %v998_v20 = vadd.f32 %v967_v2, %v273_v13  ;;  %v1020_v32 = vadd.f32 %v967_v2, %v279_v25  ;;  %v258_v38 = vld [vmem:[%s944_s27 + $0x50] sm:$0xff]  ;;  %v261_v45 = vld [vmem:[%s944_s27 + $0x68] sm:$0xff]  ;;  %v260_v46 = vld [vmem:[%s944_s27 + $0x60] sm:$0xff] }
  0x58   : > { %v315_v23 = vmul.f32 %v972_v3, %v991_v16  ;;  %v1006_v24 = vadd.f32 %v967_v2, %v277_v14  ;;  %v1012_v27 = vadd.f32 %v967_v2, %v276_v17  ;;  %v281_v33 = vmul.f32 %v962_v1, %v257_v29  ;;  %v263_v53 = vld [vmem:[%s944_s27 + $0x78] sm:$0xff]  ;;  %v262_v54 = vld [vmem:[%s944_s27 + $0x70] sm:$0xff]  ;;  %v232_v6 = vld [vmem:[%s952_s9] sm:$0xff]  ;;  %s678_s27 = scalar_lea.vmem %s1161_s22, 2048 }
  0x59   : > { %v312_v22 = vmul.f32 %v972_v3, %v988_v15  ;;  %332 = vadd.xlane.f32.xlu1 %v314_v19  ;;  %v313_v26 = vmul.f32 %v972_v3, %v998_v20  ;;  %v1026_v35 = vadd.f32 %v967_v2, %v278_v28  ;;  %v280_v36 = vmul.f32 %v962_v1, %v256_v30  ;;  %v234_v5 = vld [vmem:[%s952_s9 + $0x10] sm:$0xff]  ;;  %v1090_v7 = vld [vmem:[%s1210_s2 + $0x3] ss:$0 sm:$0xff]  ;;  %v235_v11 = vld [vmem:[%s952_s9 + $0x18] sm:$0xff]  ;;  %p679_p13 = scmp.ne.s32.totalorder %s1161_s22, %s678_s27 }
  0x5a   : > { %v317_v31 = vmul.f32 %v972_v3, %v1006_v24  ;;  %v316_v34 = vmul.f32 %v972_v3, %v1012_v27  ;;  %v319_v39 = vmul.f32 %v972_v3, %v1020_v32  ;;  %v1034_v40 = vadd.f32 %v967_v2, %v281_v33  ;;  %v237_v25 = vld [vmem:[%s952_s9 + $0x28] sm:$0xff]  ;;  %v236_v28 = vld [vmem:[%s952_s9 + $0x20] sm:$0xff] }
  0x5b   : > { %328 = vadd.xlane.f32.xlu0 %v312_v22  ;;  %v283_v41 = vmul.f32 %v962_v1, %v259_v37  ;;  %v318_v42 = vmul.f32 %v972_v3, %v1026_v35  ;;  %v1040_v43 = vadd.f32 %v967_v2, %v280_v36  ;;  %v282_v44 = vmul.f32 %v962_v1, %v258_v38  ;;  %v239_v36 = vld [vmem:[%s952_s9 + $0x38] sm:$0xff]  ;;  %v238_v38 = vld [vmem:[%s952_s9 + $0x30] sm:$0xff]  ;;  %p680_p12 = pnand %p679_p13, %p1221_p1 }
  0x5c   : > { %v321_v47 = vmul.f32 %v972_v3, %v1034_v40  ;;  %v285_v49 = vmul.f32 %v962_v1, %v261_v45  ;;  %v284_v52 = vmul.f32 %v962_v1, %v260_v46  ;;  %v287_v57 = vmul.f32 %v962_v1, %v263_v53  ;;  %v241_v46 = vld [vmem:[%s952_s9 + $0x48] sm:$0xff] }
  0x5d   : > { %334 = vadd.xlane.f32.xlu1 %v315_v23  ;;  %v1048_v48 = vadd.f32 %v967_v2, %v283_v41  ;;  %v320_v50 = vmul.f32 %v972_v3, %v1040_v43  ;;  %v1054_v51 = vadd.f32 %v967_v2, %v282_v44  ;;  %v286_v60 = vmul.f32 %v962_v1, %v262_v54  ;;  %p681_p10 = pneg %p680_p12 }
  0x5e   : > { %v1062_v56 = vadd.f32 %v967_v2, %v285_v49  ;;  %v1068_v59 = vadd.f32 %v967_v2, %v284_v52  ;;  %v1074_v62 = vadd.f32 %v967_v2, %v287_v57  ;;  %v240_v49 = vld [vmem:[%s952_s9 + $0x40] sm:$0xff]  ;;  %v243_v57 = vld [vmem:[%s952_s9 + $0x58] sm:$0xff] }
  0x5f   : > { %330 = vadd.xlane.f32.xlu0 %v313_v26  ;;  %v323_v55 = vmul.f32 %v972_v3, %v1048_v48  ;;  %v322_v58 = vmul.f32 %v972_v3, %v1054_v51  ;;  %v1079_v0 = vadd.f32 %v967_v2, %v286_v60  ;;  %v242_v60 = vld [vmem:[%s952_s9 + $0x50] sm:$0xff] }
  0x60   : > { %v325_v61 = vmul.f32 %v972_v3, %v1062_v56  ;;  %v324_v63 = vmul.f32 %v972_v3, %v1068_v59  ;;  %v327_v1 = vmul.f32 %v972_v3, %v1074_v62 }
  0x61   : > { %338 = vadd.xlane.f32.xlu1 %v317_v31  ;;  %v326_v4 = vmul.f32 %v972_v3, %v1079_v0  ;;  %v233_v3 = vld [vmem:[%s952_s9 + $0x8] sm:$0xff] }
  0x63   : > { %336 = vadd.xlane.f32.xlu0 %v316_v34 }
  0x65   : > { %342 = vadd.xlane.f32.xlu1 %v319_v39 }
  0x67   : > { %340 = vadd.xlane.f32.xlu0 %v318_v42 }
  0x69   : > { %346 = vadd.xlane.f32.xlu1 %v321_v47 }
  0x6b   : > { %344 = vadd.xlane.f32.xlu0 %v320_v50 }
  0x6d   : > { %350 = vadd.xlane.f32.xlu1 %v323_v55 }
  0x6f   : > { %348 = vadd.xlane.f32.xlu0 %v322_v58 }
  0x71   : > { %354 = vadd.xlane.f32.xlu1 %v325_v61 }
  0x73   : > { %352 = vadd.xlane.f32.xlu0 %v324_v63 }
  0x75   : > { %358 = vadd.xlane.f32.xlu1 %v327_v1 }
  0x77   : > { %356 = vadd.xlane.f32.xlu0 %v326_v4 }
  0xe6   : > { %v333_v2 = vpop.xlane.xlu1 %332 }
  0xe7   : > { %v362_v8 = vmul.f32 %v333_v2, %v234_v5 }
  0xe8   : > { %v329_v9 = vpop.xlane.xlu0 %328 }
  0xe9   : > { %v360_v10 = vmul.f32 %v329_v9, %v232_v6  ;;  %v382_v13 = vadd.f32 %v1090_v7, %v362_v8  ;;  %v245_v6 = vld [vmem:[%s952_s9 + $0x68] sm:$0xff]  ;;  %v244_v8 = vld [vmem:[%s952_s9 + $0x60] sm:$0xff] }
  0xea   : > { %v335_v17 = vpop.xlane.xlu1 %334 }
  0xeb   : > { %v380_v14 = vadd.f32 %v1090_v7, %v360_v10  ;;  %v398_v18 = vadd.f32 %v382_v13, %v983_v12  ;;  %v363_v19 = vmul.f32 %v335_v17, %v235_v11 }
  0xec   : > { %v331_v21 = vpop.xlane.xlu0 %330 }
  0xed   : > { %v396_v22 = vadd.f32 %v380_v14, %v988_v15  ;;  %v361_v23 = vmul.f32 %v331_v21, %v233_v3  ;;  %414 = vst [vmem:[%s1100_s28 + $0x10] sm:$0xff] %v398_v18  ;;  %v383_v26 = vadd.f32 %v1090_v7, %v363_v19  ;;  %v247_v14 = vld [vmem:[%s952_s9 + $0x78] sm:$0xff]  ;;  %v246_v18 = vld [vmem:[%s952_s9 + $0x70] sm:$0xff]  ;;  %s682_s9 = sshll.u32 %s754_s26, 4  ;;  %s683_s9 = int_to_ptr.vmem [resolvable:$false] %s682_s9 }
  0xee   : > { %v339_v29 = vpop.xlane.xlu1 %338  ;;  %s684_s10 = scalar_lea.vmem %s683_s9, 4096  ;;  %p685_p5 = scmp.lt.s32.totalorder %s1161_s22, %s683_s9 }
  0xef   : > { %412 = vst [vmem:[%s1100_s28] sm:$0xff] %v396_v22  ;;  %v381_v12 = vadd.f32 %v1090_v7, %v361_v23  ;;  %v399_v30 = vadd.f32 %v383_v26, %v991_v16  ;;  %v365_v15 = vmul.f32 %v339_v29, %v237_v25  ;;  %p686_p7 = scmp.lt.s32.totalorder %s684_s10, %s678_s27 }
  0xf0   : > { %v337_v31 = vpop.xlane.xlu0 %336 }
  0xf1   : > { %v397_v33 = vadd.f32 %v381_v12, %v998_v20  ;;  %v364_v34 = vmul.f32 %v337_v31, %v236_v28  ;;  %415 = vst [vmem:[%s1100_s28 + $0x18] sm:$0xff] %v399_v30  ;;  %v385_v37 = vadd.f32 %v1090_v7, %v365_v15  ;;  %p687_p9 = por %p686_p7, %p685_p5 }
  0xf2   : > { %v343_v41 = vpop.xlane.xlu1 %342 }
  0xf3   : > { %413 = vst [vmem:[%s1100_s28 + $0x8] sm:$0xff] %v397_v33  ;;  %v384_v39 = vadd.f32 %v1090_v7, %v364_v34  ;;  %v401_v16 = vadd.f32 %v385_v37, %v1006_v24  ;;  %v367_v42 = vmul.f32 %v343_v41, %v239_v36  ;;  %p688_p11 = pnand %p687_p9, %p681_p10 }
  0xf4   : > { %v341_v44 = vpop.xlane.xlu0 %340 }
  0xf5   : > { %v400_v20 = vadd.f32 %v384_v39, %v1012_v27  ;;  %v366_v45 = vmul.f32 %v341_v44, %v238_v38  ;;  %417 = vst [vmem:[%s1100_s28 + $0x28] sm:$0xff] %v401_v16  ;;  %v387_v47 = vadd.f32 %v1090_v7, %v367_v42 }
  0xf6   : > { %v347_v52 = vpop.xlane.xlu1 %346 }
  0xf7   : > { %416 = vst [vmem:[%s1100_s28 + $0x20] sm:$0xff] %v400_v20  ;;  %v386_v50 = vadd.f32 %v1090_v7, %v366_v45  ;;  %v403_v24 = vadd.f32 %v387_v47, %v1020_v32  ;;  %v369_v53 = vmul.f32 %v347_v52, %v241_v46 }
  0xf8   : > { %v345_v54 = vpop.xlane.xlu0 %344 }
  0xf9   : > { %v402_v27 = vadd.f32 %v386_v50, %v1026_v35  ;;  %v368_v55 = vmul.f32 %v345_v54, %v240_v49  ;;  %419 = vst [vmem:[%s1100_s28 + $0x38] sm:$0xff] %v403_v24  ;;  %v389_v58 = vadd.f32 %v1090_v7, %v369_v53 }
  0xfa   : > { %v351_v63 = vpop.xlane.xlu1 %350 }
  0xfb   : > { %418 = vst [vmem:[%s1100_s28 + $0x30] sm:$0xff] %v402_v27  ;;  %v388_v61 = vadd.f32 %v1090_v7, %v368_v55  ;;  %v405_v32 = vadd.f32 %v389_v58, %v1034_v40  ;;  %v371_v1 = vmul.f32 %v351_v63, %v243_v57 }
  0xfc   : > { %v349_v4 = vpop.xlane.xlu0 %348 }
  0xfd   : > { %v404_v35 = vadd.f32 %v388_v61, %v1040_v43  ;;  %v370_v5 = vmul.f32 %v349_v4, %v242_v60  ;;  %421 = vst [vmem:[%s1100_s28 + $0x48] sm:$0xff] %v405_v32  ;;  %v391_v2 = vadd.f32 %v1090_v7, %v371_v1 }
  0xfe   : > { %v355_v10 = vpop.xlane.xlu1 %354 }
  0xff   : > { %420 = vst [vmem:[%s1100_s28 + $0x40] sm:$0xff] %v404_v35  ;;  %v390_v9 = vadd.f32 %v1090_v7, %v370_v5  ;;  %v407_v40 = vadd.f32 %v391_v2, %v1048_v48  ;;  %v373_v11 = vmul.f32 %v355_v10, %v245_v6 }
 0x100   : > { %v353_v13 = vpop.xlane.xlu0 %352 }
 0x101   : > { %v406_v43 = vadd.f32 %v390_v9, %v1054_v51  ;;  %v372_v3 = vmul.f32 %v353_v13, %v244_v8  ;;  %423 = vst [vmem:[%s1100_s28 + $0x58] sm:$0xff] %v407_v40  ;;  %v393_v17 = vadd.f32 %v1090_v7, %v373_v11 }
 0x102   : > { %v359_v21 = vpop.xlane.xlu1 %358 }
 0x103   : > { %422 = vst [vmem:[%s1100_s28 + $0x50] sm:$0xff] %v406_v43  ;;  %v392_v19 = vadd.f32 %v1090_v7, %v372_v3  ;;  %v409_v48 = vadd.f32 %v393_v17, %v1062_v56  ;;  %v375_v22 = vmul.f32 %v359_v21, %v247_v14 }
 0x104   : > { %v357_v23 = vpop.xlane.xlu0 %356 }
 0x105   : > { %v408_v51 = vadd.f32 %v392_v19, %v1068_v59  ;;  %v374_v25 = vmul.f32 %v357_v23, %v246_v18  ;;  %425 = vst [vmem:[%s1100_s28 + $0x68] sm:$0xff] %v409_v48  ;;  %v395_v26 = vadd.f32 %v1090_v7, %v375_v22 }
 0x107   : > { %424 = vst [vmem:[%s1100_s28 + $0x60] sm:$0xff] %v408_v51  ;;  %v394_v28 = vadd.f32 %v1090_v7, %v374_v25  ;;  %v411_v12 = vadd.f32 %v395_v26, %v1074_v62 }
 0x109   : > { %v410_v56 = vadd.f32 %v394_v28, %v1079_v0  ;;  %427 = vst [vmem:[%s1100_s28 + $0x78] sm:$0xff] %v411_v12 }
 0x10b   : > { %426 = vst [vmem:[%s1100_s28 + $0x70] sm:$0xff] %v410_v56 }
 0x10c   : > { %691 = shalt.err (!%p688_p11)
}
 0x10d   : > { %s692_s11 = scalar_lea.hbm %s1159_s7, 2048  ;;  %s696_s4 = scalar_lea.hbm %s1211_s3, 4096 }
 0x10e   : > { %p693_p3 = scmp.ne.s32.totalorder %s1159_s7, %s692_s11  ;;  %p697_p2 = scmp.lt.u32.totalorder %s1159_s7, %s1211_s3 }
 0x10f   : > { %p698_p4 = scmp.lt.u32.totalorder %s696_s4, %s692_s11  ;;  %p700_p13 = scmp.lt.u32.totalorder %s692_s11, %s1159_s7 }
 0x110   : > { %p694_p8 = pnand %p693_p3, %p1221_p1 }
 0x111   : > { %p699_p6 = por %p698_p4, %p697_p2 }
 0x112   : > { %p695_p0 = pneg %p694_p8 }
 0x113   : > { %p701_p12 = por %p700_p13, %p699_p6 }
 0x115   : > { %p702_p10 = pnand %p701_p12, %p695_p0 }
 0x117   : > { %705 = shalt.err (!%p702_p10)
}
 0x118   : > { %s755_s17 = smov 128   ;;  %s756_s28 = smov 8  }
 0x119   : > { %567 = dma.vmem_to_hbm [thread:$0]  (%p1221_p1), %s1161_s22, 2048, %s1159_s7, %s429_s16, %s755_s17, %s755_s17, %s756_s28  }
 0x11a PF: > { %s457_s19 = sand.u32 1, %s736_s12   ;;  %p1222_p5 = scmp.ne.s32.totalorder %s1217_s25, 0 }
 0x11b   : > { %p1223_p7 = scmp.ge.s32.totalorder %s748_s15, 2  ;;  %s458_s8 = scalar_lea.sflag [#allocation4], %s457_s19 }
 0x11d   : > { %p577_p9 = pnand %p1223_p7, %p1222_p5 }
 0x11f   : > { %731 = dma.done.wait (!%p577_p9), %s458_s8, 2048  }
 0x120   : > { %733 = vsyncadd (!%p577_p9), %s458_s8, 4294965248  ;;  %p19_p11 = scmp.ge.s32.totalorder %s802_s18, 4   ;;  %s1224_s12 = smov %s740_s13 }
 0x121   : > { %s1225_s13 = smov %s744_s14  ;;  %s1226_s14 = smov %s814_s21 }
 0x122   : > { %s1227_s15 = smov %s802_s18  ;;  %21 = sbr.rel (!%p19_p11) target bundleno = 7 (0x7), region = 90 }
 0x129   :  { %463 = vsyncpa [#allocation3], 1 }
 0x12a   :  { %465 = vsyncpa [#allocation3 + $0x1], 1 }
 0x12b   :  { %466 = vsyncpa [#allocation6], 1 }
 0x12c   :  { %468 = vsyncpa [#allocation6 + $0x1], 1 }
 0x12d   :  { %469 = vsyncpa [#allocation4], 1 }
 0x12e   :  { %471 = vsyncpa [#allocation4 + $0x1], 1 }

</bundles_post_ra>
